<compile_context>
chip_gen: v7x
topology: tpu7x:2x2x1
jax: 0.10.0
libtpu: 0.0.40
codegen_flags: <defaults>
</compile_context>

<pallas_src>
import jax
import jax.numpy as jnp
from jax.experimental import pallas as pl
from jax.experimental.pallas import tpu as pltpu


def _round_up(x, m):
    return ((x + m - 1) // m) * m


def mlp_kernel(x_ref, w1_ref, b1_ref, w2_ref, b2_ref, o_ref):
    # x_ref : (TBp, Fp)  streamed packed-batch tile (Fp = P*F, = 128 lanes when packed)
    # w1_ref: (Fp, Hp)   resident block-diagonal packed first-layer weight
    # b1_ref: (1, Hp)    resident tiled first-layer bias
    # w2_ref: (Hp, P)    resident block-diagonal packed second-layer weight
    # b2_ref: (1,)       SMEM scalar second-layer bias
    # o_ref : (TBp, P)   packed output (row-major == original batch order)
    h = jnp.dot(x_ref[...], w1_ref[...], preferred_element_type=jnp.float32)   # (TBp, Hp)
    h = jnp.maximum(h + b1_ref[...], 0.0)                                       # ReLU
    y = jnp.dot(h, w2_ref[...], preferred_element_type=jnp.float32)             # (TBp, P)
    o_ref[...] = (y + b2_ref[0]).astype(o_ref.dtype)


def multiple_regression(x, w1, b1, w2, b2, *, tile_rows=None):
    """x: [B, F]; w1: [F, H]; b1: [H]; w2: [H, 1]; b2: [1]  -> [B, 1]"""
    B, F = x.shape
    H = w1.shape[1]
    assert w1.shape == (F, H) and w2.shape == (H, 1)
    assert b1.shape == (H,) and b2.shape == (1,)

    # ---- feature packing factor: fill the 128-lane vreg with P batch rows -------------
    P = 128 // F if (F < 128 and 128 % F == 0) else 1
    while P > 1 and B % P != 0:          # keep the packing reshape free (no pad, no copy)
        P //= 2
    Bp, Fp, Hp = B // P, P * F, P * H

    # Packed operands (built once; tiny).
    eye = jnp.eye(P, dtype=w1.dtype)
    w1p = jnp.kron(eye, w1)                       # (Fp, Hp) block-diagonal
    w2p = jnp.kron(eye, w2)                       # (Hp, P)  block-diagonal
    b1p = jnp.tile(b1, P).reshape(1, Hp)          # (1, Hp)
    b2s = b2.reshape(1)                           # SMEM scalar
    xp = x.reshape(Bp, Fp)                        # free row-major dim-merge reshape

    # ---- per-generation VMEM budget / tile sizing --------------------------------------
    try:
        kind = jax.devices()[0].device_kind.lower()
    except Exception:
        kind = ""
    is_v7 = "v7" in kind
    vmem_limit = (48 if is_v7 else 80) * 1024 * 1024

    itemsize = x.dtype.itemsize
    lanes_x = _round_up(Fp, 128)
    lanes_h = _round_up(Hp, 128)
    lanes_o = _round_up(P, 128)
    # x double-buffered + h & pre-ReLU temp (f32, lane-padded) + out double-buffered.
    bytes_per_row = (2 * lanes_x * itemsize) + (2 * lanes_h * 4) + (2 * lanes_o * itemsize)

    if tile_rows is None:
        tile_bp = (int(0.70 * vmem_limit) // bytes_per_row) // 8 * 8
        tile_bp = max(8, min(tile_bp, 65536))
    else:
        tile_bp = max(8, _round_up(tile_rows, 8))
    if Bp <= tile_bp:
        tile_bp = Bp                               # single full-extent block (always legal)
    if is_v7 and Bp > 16:
        # Keep >= 2 parallel grid steps so both v7x TensorCores get work.
        tile_bp = min(tile_bp, _round_up(pl.cdiv(Bp, 2), 8))
    n_tiles = pl.cdiv(Bp, tile_bp)

    cost = pl.CostEstimate(
        flops=2 * B * F * H + 4 * B * H + 2 * B,
        transcendentals=0,
        bytes_accessed=(xp.size + w1p.size + b1p.size + w2p.size) * itemsize + B * itemsize,
    )

    out = pl.pallas_call(
        mlp_kernel,
        out_shape=jax.ShapeDtypeStruct((Bp, P), x.dtype),
        grid=(n_tiles,),
        in_specs=[
            pl.BlockSpec((tile_bp, Fp), lambda i: (i, 0)),        # x: streamed
            pl.BlockSpec((Fp, Hp), lambda i: (0, 0)),             # W1 packed: resident
            pl.BlockSpec((1, Hp), lambda i: (0, 0)),              # b1 packed: resident
            pl.BlockSpec((Hp, P), lambda i: (0, 0)),              # W2 packed: resident
            pl.BlockSpec(memory_space=pltpu.MemorySpace.SMEM),    # b2: scalar in SMEM
        ],
        out_specs=pl.BlockSpec((tile_bp, P), lambda i: (i, 0)),
        compiler_params=pltpu.CompilerParams(
            dimension_semantics=("parallel",),
            vmem_limit_bytes=vmem_limit,
        ),
        cost_estimate=cost,
    )(xp, w1p, b1p, w2p, b2s)

    # (Bp, P) row-major == original batch order; free reshape back to (B, 1).
    return out.reshape(B, 1)


def init_params(key, num_features, hidden=16):
    # Deterministic init mimicking nn.Linear's U(-1/sqrt(fan_in), 1/sqrt(fan_in)).
    k1, k2, k3, k4 = jax.random.split(key, 4)
    bound1 = 1.0 / jnp.sqrt(num_features)
    bound2 = 1.0 / jnp.sqrt(hidden)
    w1 = jax.random.uniform(k1, (num_features, hidden), jnp.float32, -bound1, bound1)
    b1 = jax.random.uniform(k2, (hidden,), jnp.float32, -bound1, bound1)
    w2 = jax.random.uniform(k3, (hidden, 1), jnp.float32, -bound2, bound2)
    b2 = jax.random.uniform(k4, (1,), jnp.float32, -bound2, bound2)
    return w1, b1, w2, b2


if __name__ == "__main__":
    key = jax.random.PRNGKey(0)
    k_x, k_p = jax.random.split(key)

    batch, num_features = 16, 32
    x = jax.random.normal(k_x, (batch, num_features), jnp.float32)
    w1, b1, w2, b2 = init_params(k_p, num_features)

    out = multiple_regression(x, w1, b1, w2, b2)
    out = jax.block_until_ready(out)

    # Pure-JAX reference check of the forward semantics.
    ref = jnp.maximum(x @ w1 + b1, 0.0) @ w2 + b2
    assert out.shape == (batch, 1)
    assert jnp.allclose(out, ref, atol=1e-4, rtol=1e-4)

    print("KERNEL_OK")
</pallas_src>

<mosaic_0001>
module attributes {stable_mosaic.version = 11 : i64} {
  func.func @mlp_kernel(%arg0: i32, %arg1: memref<4x128xf32, #tpu.memory_space<vmem>>, %arg2: memref<128x64xf32, #tpu.memory_space<vmem>>, %arg3: memref<1x64xf32, #tpu.memory_space<vmem>>, %arg4: memref<64x4xf32, #tpu.memory_space<vmem>>, %arg5: memref<1xf32, #tpu.memory_space<smem>>, %arg6: memref<4x4xf32, #tpu.memory_space<vmem>>) attributes {dimension_semantics = [#tpu.dimension_semantics<parallel>], iteration_bounds = array<i64: 1>, scalar_prefetch = 0 : i64, scratch_operands = 0 : i64, tpu.core_type = #tpu.core_type<tc>, window_params = [{transform_indices = @transform_0, window_bounds = array<i64: 4, 128>}, {pipeline_mode = #tpu.pipeline_mode<synchronous>, transform_indices = @transform_1, window_bounds = array<i64: 128, 64>}, {pipeline_mode = #tpu.pipeline_mode<synchronous>, transform_indices = @transform_2, window_bounds = array<i64: 1, 64>}, {pipeline_mode = #tpu.pipeline_mode<synchronous>, transform_indices = @transform_3, window_bounds = array<i64: 64, 4>}, {transform_indices = @transform_4, window_bounds = array<i64: 1>}, {transform_indices = @transform_5, window_bounds = array<i64: 4, 4>}]} {
    %c0 = arith.constant 0 : index
    %c0_0 = arith.constant 0 : index
    %0 = vector.load %arg1[%c0, %c0_0] : memref<4x128xf32, #tpu.memory_space<vmem>>, vector<4x128xf32>
    %c0_1 = arith.constant 0 : index
    %c0_2 = arith.constant 0 : index
    %1 = vector.load %arg2[%c0_1, %c0_2] : memref<128x64xf32, #tpu.memory_space<vmem>>, vector<128x64xf32>
    %cst = arith.constant dense<0.000000e+00> : vector<4x64xf32>
    %2 = tpu.matmul %0, %1, %cst {dimension_numbers = #tpu.dot_dimension_numbers<[1], [0], [0], [1], [0, 0, 1, 1], [], []>} : vector<4x128xf32>, vector<128x64xf32>, vector<4x64xf32> -> vector<4x64xf32>
    %c0_3 = arith.constant 0 : index
    %c0_4 = arith.constant 0 : index
    %3 = vector.load %arg3[%c0_3, %c0_4] : memref<1x64xf32, #tpu.memory_space<vmem>>, vector<1x64xf32>
    %4 = vector.broadcast %3 : vector<1x64xf32> to vector<4x64xf32>
    %5 = arith.addf %2, %4 : vector<4x64xf32>
    %cst_5 = arith.constant 0.000000e+00 : f32
    %6 = vector.broadcast %cst_5 : f32 to vector<4x64xf32>
    %7 = arith.maximumf %5, %6 : vector<4x64xf32>
    %c0_6 = arith.constant 0 : index
    %c0_7 = arith.constant 0 : index
    %8 = vector.load %arg4[%c0_6, %c0_7] : memref<64x4xf32, #tpu.memory_space<vmem>>, vector<64x4xf32>
    %cst_8 = arith.constant dense<0.000000e+00> : vector<4x4xf32>
    %9 = tpu.matmul %7, %8, %cst_8 {dimension_numbers = #tpu.dot_dimension_numbers<[1], [0], [0], [1], [0, 0, 1, 1], [], []>} : vector<4x64xf32>, vector<64x4xf32>, vector<4x4xf32> -> vector<4x4xf32>
    %c0_9 = arith.constant 0 : index
    %10 = memref.load %arg5[%c0_9] : memref<1xf32, #tpu.memory_space<smem>>
    %11 = vector.broadcast %10 : f32 to vector<4x4xf32>
    %12 = arith.addf %9, %11 : vector<4x4xf32>
    %c0_10 = arith.constant 0 : index
    %c0_11 = arith.constant 0 : index
    %13 = vector.load %arg6[%c0_10, %c0_11] : memref<4x4xf32, #tpu.memory_space<vmem>>, vector<4x4xf32>
    tpu.vector_store %arg6[%c0_10, %c0_11], %12 {strides = array<i32>} : memref<4x4xf32, #tpu.memory_space<vmem>>, vector<4x4xf32>,
    return
  }
  func.func @transform_0(%arg0: i32) -> (i32, i32) {
    %c0_i32 = arith.constant 0 : i32
    %c0_i32_0 = arith.constant 0 : i32
    return %arg0, %c0_i32 : i32, i32
  }
  func.func @transform_1(%arg0: i32) -> (i32, i32) {
    %c0_i32 = arith.constant 0 : i32
    %c0_i32_0 = arith.constant 0 : i32
    %c0_i32_1 = arith.constant 0 : i32
    return %c0_i32, %c0_i32_0 : i32, i32
  }
  func.func @transform_2(%arg0: i32) -> (i32, i32) {
    %c0_i32 = arith.constant 0 : i32
    %c0_i32_0 = arith.constant 0 : i32
    %c0_i32_1 = arith.constant 0 : i32
    return %c0_i32, %c0_i32_0 : i32, i32
  }
  func.func @transform_3(%arg0: i32) -> (i32, i32) {
    %c0_i32 = arith.constant 0 : i32
    %c0_i32_0 = arith.constant 0 : i32
    %c0_i32_1 = arith.constant 0 : i32
    return %c0_i32, %c0_i32_0 : i32, i32
  }
  func.func @transform_4(%arg0: i32) -> i32 {
    %c0_i32 = arith.constant 0 : i32
    %c0_i32_0 = arith.constant 0 : i32
    return %c0_i32 : i32
  }
  func.func @transform_5(%arg0: i32) -> (i32, i32) {
    %c0_i32 = arith.constant 0 : i32
    %c0_i32_0 = arith.constant 0 : i32
    return %arg0, %c0_i32 : i32, i32
  }
}

</mosaic_0001>

<bundles_post_ra>
// kernel: tpu_custom_call.1
= control target key start
LH: loop header
LB: loop body
LE: loop exit
PB: predicated region body
PF: predicated region fallthrough
CT: control target
= control target key end

     0   :  { %11 = vsyncpa [#allocation4], 0  ;;  %s626_s0 = inlined_call_operand.hbm [shape: f32[4,128], index: 0, kind: input, shape index: {}]   ;;  %s627_s1 = inlined_call_operand.hbm [shape: f32[128,64], index: 1, kind: input, shape index: {}]   ;;  %s628_s2 = inlined_call_operand.hbm [shape: f32[1,64], index: 2, kind: input, shape index: {}]   ;;  %s629_s3 = inlined_call_operand.hbm [shape: f32[64,4], index: 3, kind: input, shape index: {}]   ;;  %s630_s4 = inlined_call_operand.<no memory space> [shape: f32[1], index: 4, kind: input, shape index: {}]   ;;  %s631_s5 = inlined_call_operand.hbm [shape: f32[4,4], index: 5, kind: output, shape index: {}]  }
   0x1   :  { %12 = vsyncpa [#allocation7], 0 }
   0x2   :  { %13 = vsyncpa [#allocation10], 0 }
   0x3   :  { %14 = vsyncpa [#allocation5], 0  ;;  %s517_s18 = smov [#allocation6]   ;;  %s399_s22 = scalar_lea.hbm %s627_s1, 2048 }
   0x4   :  { %s30_s19 = sshll.u32 %s517_s18, 4  ;;  %p400_p0 = scmp.ne.s32.totalorder %s627_s1, %s399_s22  ;;  %s31_s19 = int_to_ptr.vmem [resolvable:$true] %s30_s19 }
   0x5   :  { %p403_p1 = scmp.lt.u32.totalorder %s399_s22, %s627_s1 }
   0x7   :  { %p405_p2 = pnand %p403_p1, %p400_p0 }
   0x9   :  { %408 = shalt.err (!%p405_p2)
}
   0xa   :  { %s409_s27 = scalar_lea.vmem %s31_s19, 2048  ;;  %p414_p4 = scmp.lt.s32.totalorder %s31_s19, %s31_s19 }
   0xb   :  { %p410_p3 = scmp.ne.s32.totalorder %s31_s19, %s409_s27  ;;  %p415_p5 = scmp.lt.s32.totalorder %s409_s27, %s409_s27 }
   0xd   :  { %p416_p6 = por %p415_p5, %p414_p4 }
   0xf   :  { %p417_p7 = pnand %p416_p6, %p410_p3 }
  0x11   :  { %420 = shalt.err (!%p417_p7)
}
  0x12   :  { %s518_s28 = smov 128   ;;  %s519_s29 = smov 8  }
  0x13   :  { %36 = dma.hbm_to_vmem [thread:$0]  %s627_s1, 2048, %s31_s19, [#allocation7], %s518_s28, %s518_s28, %s519_s29  }
  0x14   :  { %s520_s7 = smov [#allocation3]   ;;  %s521_s9 = smov [#allocation8]  }
  0x15   :  { %s21_s8 = sshll.u32 %s520_s7, 4  ;;  %s43_s10 = sshll.u32 %s521_s9, 4  ;;  %s22_s8 = int_to_ptr.vmem [resolvable:$true] %s21_s8  ;;  %s44_s10 = int_to_ptr.vmem [resolvable:$true] %s43_s10 }
  0x16   :  { %s421_s13 = scalar_lea.hbm %s626_s0, 64 }
  0x17   :  { %p422_p8 = scmp.ne.s32.totalorder %s626_s0, %s421_s13  ;;  %p425_p9 = scmp.lt.u32.totalorder %s421_s13, %s626_s0 }
  0x19   :  { %p427_p10 = pnand %p425_p9, %p422_p8 }
  0x1b   :  { %430 = shalt.err (!%p427_p10)
}
  0x1c   :  { %s431_s1 = scalar_lea.vmem %s22_s8, 64  ;;  %p436_p12 = scmp.lt.s32.totalorder %s22_s8, %s22_s8 }
  0x1d   :  { %p432_p11 = scmp.ne.s32.totalorder %s22_s8, %s431_s1  ;;  %p437_p13 = scmp.lt.s32.totalorder %s431_s1, %s431_s1 }
  0x1f   :  { %p438_p0 = por %p437_p13, %p436_p12 }
  0x21   :  { %p439_p1 = pnand %p438_p0, %p432_p11 }
  0x23   :  { %442 = shalt.err (!%p439_p1)
}
  0x24   :  { %24 = dma.hbm_to_vmem [thread:$0]  %s626_s0, 64, %s22_s8, [#allocation4]  }
  0x25   :  { %s443_s22 = scalar_lea.hbm %s628_s2, 16 }
  0x26   :  { %p444_p2 = scmp.ne.s32.totalorder %s628_s2, %s443_s22  ;;  %p447_p3 = scmp.lt.u32.totalorder %s443_s22, %s628_s2 }
  0x28   :  { %p449_p4 = pnand %p447_p3, %p444_p2 }
  0x2a   :  { %452 = shalt.err (!%p449_p4)
}
  0x2b   :  { %s453_s27 = scalar_lea.vmem %s44_s10, 16  ;;  %s457_s30 = scalar_lea.vmem %s44_s10, 32 }
  0x2c   :  { %p454_p5 = scmp.ne.s32.totalorder %s44_s10, %s453_s27  ;;  %p458_p6 = scmp.lt.s32.totalorder %s44_s10, %s44_s10 }
  0x2d   :  { %p459_p7 = scmp.lt.s32.totalorder %s457_s30, %s453_s27 }
  0x2f   :  { %p460_p8 = por %p459_p7, %p458_p6 }
  0x31   :  { %p461_p9 = pnand %p460_p8, %p454_p5 }
  0x33   :  { %464 = shalt.err (!%p461_p9)
}
  0x34   :  { %46 = dma.hbm_to_vmem [thread:$0]  %s628_s2, 16, %s44_s10, [#allocation7]  }
  0x35   :  { %s522_s7 = smov [#allocation9]   ;;  %s465_s12 = scalar_lea.hbm %s629_s3, 1024 }
  0x36   :  { %s52_s8 = sshll.u32 %s522_s7, 4  ;;  %p466_p10 = scmp.ne.s32.totalorder %s629_s3, %s465_s12  ;;  %s53_s8 = int_to_ptr.vmem [resolvable:$true] %s52_s8 }
  0x37   :  { %p469_p11 = scmp.lt.u32.totalorder %s465_s12, %s629_s3 }
  0x39   :  { %p471_p12 = pnand %p469_p11, %p466_p10 }
  0x3b   :  { %474 = shalt.err (!%p471_p12)
}
  0x3c   :  { %s475_s17 = scalar_lea.vmem %s53_s8, 1024  ;;  %p480_p0 = scmp.lt.s32.totalorder %s53_s8, %s53_s8 }
  0x3d   :  { %p476_p13 = scmp.ne.s32.totalorder %s53_s8, %s475_s17  ;;  %p481_p1 = scmp.lt.s32.totalorder %s475_s17, %s475_s17 }
  0x3f   :  { %p482_p2 = por %p481_p1, %p480_p0 }
  0x41   :  { %p483_p3 = pnand %p482_p2, %p476_p13 }
  0x43   :  { %486 = shalt.err (!%p483_p3)
}
  0x44   :  { %58 = dma.hbm_to_vmem [thread:$0]  %s629_s3, 1024, %s53_s8, [#allocation10], %s518_s28, %s518_s28, %s519_s29  }
  0x45   :  { %509 = dma.done.wait [#allocation4], 64  }
  0x46   :  { %510 = vsyncadd [#allocation4], 4294967232 }
  0x47   :  { %511 = dma.done.wait [#allocation7], 2064  }
  0x48   :  { %512 = vsyncadd [#allocation7], 4294965232 }
  0x49   :  { %513 = dma.done.wait [#allocation10], 1024  }
  0x4a   :  { %514 = vsyncadd [#allocation10], 4294966272  ;;  %v523_v0 = vmov 0.0|0.0   ;;  %vm524_vm0 = vmmov 0   ;;  %v525_v1 = vmov 0.0   ;;  %v74_v2 = vld [vmem:[#allocation6] sm:$0xff]  ;;  %v177_v44 = vstv %s630_s4 }
  0x4b   :  { %353 = vmatprep.subr.bf16.mxu0 %v523_v0  ;;  %331 = vmatprep.mubr.msk.f32.mxu0 %vm524_vm0, %v525_v1  ;;  %v75_v3 = vld [vmem:[#allocation6 + $0x8] sm:$0xff]  ;;  %v76_v4 = vld [vmem:[#allocation6 + $0x10] sm:$0xff]  ;;  %v77_v6 = vld [vmem:[#allocation6 + $0x18] sm:$0xff]  ;;  %vm178_vm1 = vcmask 523264   ;;  %s526_s29 = smov [#allocation11]   ;;  %vm252_vm2 = vcmask 27648  }
  0x4c   :  { %377 = vmatprep.subr.bf16.mxu1 %v523_v0  ;;  %350 = vmatprep.mubr.msk.f32.mxu1 %vm524_vm0, %v525_v1  ;;  %v354_v5 = vpack.c.bf16 %v75_v3, %v74_v2  ;;  %v357_v7 = vpack.c.bf16 %v77_v6, %v76_v4  ;;  %v78_v8 = vld [vmem:[#allocation6 + $0x20] sm:$0xff]  ;;  %v79_v9 = vld [vmem:[#allocation6 + $0x28] sm:$0xff]  ;;  %v170_v12 = vld [vmem:[#allocation9 + $0x10] sm:$0xff]  ;;  %s260_s1 = sshll.u32 %s526_s29, 4  ;;  %s261_s1 = int_to_ptr.vmem [resolvable:$true] %s260_s1 }
  0x4d   :  { %v168_v10 = vld [vmem:[#allocation9] sm:$0xff]  ;;  %v169_v11 = vld [vmem:[#allocation9 + $0x8] sm:$0xff]  ;;  %v171_v13 = vld [vmem:[#allocation9 + $0x18] sm:$0xff]  ;;  %v360_v14 = vpack.c.bf16 %v79_v9, %v78_v8  ;;  %s487_s18 = scalar_lea.vmem %s261_s1, 64  ;;  %p492_p5 = scmp.lt.s32.totalorder %s261_s1, %s261_s1 }
  0x4e   :  { %355 = vmatpush3.bf16.msra.mxu0 %v354_v5  ;;  %v378_v15 = vpack.c.bf16 %v169_v11, %v168_v10  ;;  %v80_v16 = vld [vmem:[#allocation6 + $0x30] sm:$0xff]  ;;  %v81_v17 = vld [vmem:[#allocation6 + $0x38] sm:$0xff]  ;;  %v381_v18 = vpack.c.bf16 %v171_v13, %v170_v12  ;;  %v172_v19 = vld [vmem:[#allocation9 + $0x20] sm:$0xff]  ;;  %p488_p4 = scmp.ne.s32.totalorder %s261_s1, %s487_s18  ;;  %p493_p6 = scmp.lt.s32.totalorder %s487_s18, %s487_s18 }
  0x4f   :  { %356 = vmatprep.subr.bf16.mxu0 %v523_v0  ;;  %v173_v20 = vld [vmem:[#allocation9 + $0x28] sm:$0xff]  ;;  %v363_v21 = vpack.c.bf16 %v81_v17, %v80_v16  ;;  %v82_v22 = vld [vmem:[#allocation6 + $0x40] sm:$0xff]  ;;  %v85_v27 = vld [vmem:[#allocation6 + $0x58] sm:$0xff] }
  0x50   :  { %379 = vmatpush3.bf16.msra.mxu1 %v378_v15  ;;  %v83_v23 = vld [vmem:[#allocation6 + $0x48] sm:$0xff]  ;;  %v384_v24 = vpack.c.bf16 %v173_v20, %v172_v19  ;;  %v84_v26 = vld [vmem:[#allocation6 + $0x50] sm:$0xff]  ;;  %v86_v29 = vld [vmem:[#allocation6 + $0x60] sm:$0xff]  ;;  %p494_p7 = por %p493_p6, %p492_p5 }
  0x51   :  { %380 = vmatprep.subr.bf16.mxu1 %v523_v0  ;;  %v366_v25 = vpack.c.bf16 %v83_v23, %v82_v22  ;;  %v369_v28 = vpack.c.bf16 %v85_v27, %v84_v26  ;;  %v87_v30 = vld [vmem:[#allocation6 + $0x68] sm:$0xff]  ;;  %v88_v32 = vld [vmem:[#allocation6 + $0x70] sm:$0xff]  ;;  %v89_v33 = vld [vmem:[#allocation6 + $0x78] sm:$0xff] }
  0x52   :  { %358 = vmatpush3.bf16.msra.mxu0 %v357_v7  ;;  %v372_v31 = vpack.c.bf16 %v87_v30, %v86_v29  ;;  %v375_v34 = vpack.c.bf16 %v89_v33, %v88_v32  ;;  %v73_v35 = vld [vmem:[#allocation3] sm:$0xf]  ;;  %v174_v36 = vld [vmem:[#allocation9 + $0x30] sm:$0xff]  ;;  %v271_v39 = vld [vmem:[#allocation8] ss:$0 sm:$0xff]  ;;  %p495_p8 = pnand %p494_p7, %p488_p4 }
  0x53   :  { %359 = vmatprep.subr.bf16.mxu0 %v523_v0  ;;  %v175_v37 = vld [vmem:[#allocation9 + $0x38] sm:$0xff] }
  0x54   :  { %382 = vmatpush3.bf16.msra.mxu1 %v381_v18  ;;  %v387_v38 = vpack.c.bf16 %v175_v37, %v174_v36 }
  0x55   :  { %383 = vmatprep.subr.bf16.mxu1 %v523_v0 }
  0x56   :  { %361 = vmatpush3.bf16.msra.mxu0 %v360_v14 }
  0x57   :  { %362 = vmatprep.subr.bf16.mxu0 %v523_v0 }
  0x58   :  { %385 = vmatpush3.bf16.msra.mxu1 %v384_v24 }
  0x59   :  { %386 = vmatprep.subr.bf16.mxu1 %v523_v0 }
  0x5a   :  { %364 = vmatpush3.bf16.msra.mxu0 %v363_v21 }
  0x5b   :  { %365 = vmatprep.subr.bf16.mxu0 %v523_v0 }
  0x5c   :  { %388 = vmatpush3.bf16.msra.mxu1 %v387_v38 }
  0x5e   :  { %367 = vmatpush3.bf16.msra.mxu0 %v366_v25 }
  0x5f   :  { %368 = vmatprep.subr.bf16.mxu0 %v523_v0 }
  0x62   :  { %370 = vmatpush3.bf16.msra.mxu0 %v369_v28 }
  0x63   :  { %371 = vmatprep.subr.bf16.mxu0 %v523_v0 }
  0x66   :  { %373 = vmatpush3.bf16.msra.mxu0 %v372_v31 }
  0x67   :  { %374 = vmatprep.subr.bf16.mxu0 %v523_v0 }
  0x6a   :  { %376 = vmatpush3.bf16.msra.mxu0 %v375_v34 }
  0x6d   :  { %332 = vmatmul.mubr.f32.vlgmr.msra.gmra.mrb[0].mxu0 %v73_v35 }
 0x140   :  { %v163_v40 = vpop.f32.mrb[0].mxu0 }
 0x141   :  { %v164_v41 = vadd.f32 %v271_v39, %v163_v40  ;;  %v333_v42 = vpop.f32.mrb[1].mxu0 }
 0x143   :  { %v167_v43 = vmax.f32 %v164_v41, 0.0 }
 0x145   :  { %351 = vmatmul.mubr.msk.f32.vlgmr.msra.gmra.mrb[0].mxu1 %vm178_vm1, %v167_v43 }
 0x218   :  { %v248_v45 = vpop.f32.mrb[0].mxu1 }
 0x219   :  { %v249_v46 = vadd.f32 %v248_v45, %v177_v44  ;;  %v352_v47 = vpop.f32.mrb[1].mxu1 }
 0x21b   :  { %253 = vst.msk [vmem:[#allocation11] sm:$0xf] %vm252_vm2, %v249_v46 }
 0x21c   :  { %498 = shalt.err (!%p495_p8)
}
 0x21d   :  { %s499_s21 = scalar_lea.hbm %s631_s5, 64 }
 0x21e   :  { %p500_p9 = scmp.ne.s32.totalorder %s631_s5, %s499_s21  ;;  %p503_p10 = scmp.lt.u32.totalorder %s499_s21, %s631_s5 }
 0x220   :  { %p505_p11 = pnand %p503_p10, %p500_p9 }
 0x222   :  { %508 = shalt.err (!%p505_p11)
}
 0x223   :  { %263 = dma.vmem_to_hbm [thread:$0]  %s261_s1, 64, %s631_s5, [#allocation5]  }
 0x224   :  { %515 = dma.done.wait [#allocation5], 64  }
 0x225   :  { %516 = vsyncadd [#allocation5], 4294967232 }
 0x226   :  { %267 = vsyncpa [#allocation4], 1 }
 0x227   :  { %268 = vsyncpa [#allocation7], 1 }
 0x228   :  { %269 = vsyncpa [#allocation10], 1 }
 0x229   :  { %270 = vsyncpa [#allocation5], 1 }

</bundles_post_ra>
